<compile_context>
chip_gen: v7x
topology: tpu7x:2x2x1
jax: 0.10.0
libtpu: 0.0.40
codegen_flags: <defaults>
</compile_context>

<pallas_src>
import jax
import jax.numpy as jnp
from jax.experimental import pallas as pl
from jax.experimental.pallas import tpu as pltpu

_LANE = 1024           # lane-dense last dim: 8 full 128-wide f32 vregs per row
_MAX_TILE_ROWS = 1024  # (1024, 1024) f32 tile = 4 MiB; 4x live (dbl-buffered in+out) = 16 MiB


def _round_up(x, m):
    return ((x + m - 1) // m) * m


def _sublane_multiple(dtype):
    # Minimum second-to-last tile granularity: 8 (4-byte), 16 (2-byte), 32 (1-byte).
    return max(8, 32 // jnp.dtype(dtype).itemsize)


def _affine_kernel(wb_ref, x_ref, o_ref):
    # wb_ref: SMEM (2,) f32 holding [weight, bias] (scalar loads, no VMEM tile).
    # x_ref / o_ref: (tile_rows, _LANE) VMEM tiles in the caller's dtype,
    # auto-pipelined (double-buffered) by the BlockSpec grid.
    x = x_ref[...].astype(jnp.float32)           # f32 compute, native-dtype DMA
    o_ref[...] = (x * wb_ref[0] + wb_ref[1]).astype(o_ref.dtype)


def linear_regression_forward(x, weight, bias):
    """y = x @ weight.T + bias for nn.Linear(1, 1): weight (1,1), bias (1,), x (..., 1)."""
    orig_shape = x.shape
    out_dtype = x.dtype                      # output follows the input dtype (PyTorch-like)
    w = weight.reshape(()).astype(jnp.float32)
    b = bias.reshape(()).astype(jnp.float32)

    x_flat = x.reshape(-1)                   # metadata-only; no dtype conversion pass
    total = x_flat.shape[0]

    rows = total // _LANE                    # lane-aligned bulk handled by the kernel
    bulk = rows * _LANE
    tail_len = total - bulk

    pieces = []
    if rows > 0:
        # Lane-dense (rows, _LANE) view of the bulk. When total % _LANE == 0 this is a
        # pure reshape (no extra HBM traffic); otherwise only a prefix slice is taken.
        x2d = x_flat[:bulk].reshape(rows, _LANE)

        sub = _sublane_multiple(x.dtype)
        if rows <= _MAX_TILE_ROWS:
            tile_rows = rows                 # block == full row extent (always legal)
        else:
            # Even tiling: the last block is at most (sub-1) rows short instead of
            # being almost entirely padding.
            n_tiles = pl.cdiv(rows, _MAX_TILE_ROWS)
            tile_rows = _round_up(pl.cdiv(rows, n_tiles), sub)
        grid = (pl.cdiv(rows, tile_rows),)

        wb = jnp.stack([w, b])
        in_bytes = bulk * jnp.dtype(x.dtype).itemsize
        out_bytes = bulk * jnp.dtype(out_dtype).itemsize

        y2d = pl.pallas_call(
            _affine_kernel,
            out_shape=jax.ShapeDtypeStruct((rows, _LANE), out_dtype),
            grid_spec=pltpu.PrefetchScalarGridSpec(
                num_scalar_prefetch=0,
                grid=grid,
                in_specs=[
                    pl.BlockSpec(memory_space=pltpu.MemorySpace.SMEM),   # [w, b] scalars
                    pl.BlockSpec((tile_rows, _LANE), lambda i: (i, 0)),  # x tile (native dtype)
                ],
                out_specs=pl.BlockSpec((tile_rows, _LANE), lambda i: (i, 0)),
            ),
            compiler_params=pltpu.CompilerParams(
                dimension_semantics=("parallel",),   # no reduction axis; v7x shards across TCs
                vmem_limit_bytes=32 << 20),          # 4x 4 MiB live tiles fit v5e/v6e/v7x budgets
            cost_estimate=pl.CostEstimate(
                flops=2 * bulk, transcendentals=0,
                bytes_accessed=in_bytes + out_bytes),
        )(wb, x2d)
        pieces.append(y2d.reshape(-1))

    if tail_len > 0:
        # <_LANE leftover elements: plain XLA affine map (cheaper than extra kernel work).
        tail = x_flat[bulk:]
        pieces.append((tail.astype(jnp.float32) * w + b).astype(out_dtype))

    if not pieces:                            # total == 0 edge case
        return jnp.zeros(orig_shape, dtype=out_dtype)
    y_flat = pieces[0] if len(pieces) == 1 else jnp.concatenate(pieces)
    return y_flat.reshape(orig_shape)


if __name__ == "__main__":
    key = jax.random.PRNGKey(0)
    k_x, k_w, k_b = jax.random.split(key, 3)

    # nn.Linear(1, 1)-style parameters: weight (1,1), bias (1,),
    # mimicking PyTorch's U(-1, 1) init bound for fan_in=1.
    weight = jax.random.uniform(k_w, (1, 1), minval=-1.0, maxval=1.0, dtype=jnp.float32)
    bias = jax.random.uniform(k_b, (1,), minval=-1.0, maxval=1.0, dtype=jnp.float32)

    # 1) Lane-aligned f32 batch -> copy-free bulk path through the Pallas kernel.
    x1 = jax.random.normal(k_x, (8192, 1), dtype=jnp.float32)
    y1 = jax.block_until_ready(linear_regression_forward(x1, weight, bias))
    assert y1.shape == (8192, 1)
    assert jnp.allclose(y1, x1 @ weight.T + bias, atol=1e-6), "mismatch (aligned f32)"

    # 2) Unaligned batch -> kernel on the 8192-element bulk + XLA tail (257 elems).
    x2 = jax.random.normal(k_x, (8449, 1), dtype=jnp.float32)
    y2 = jax.block_until_ready(linear_regression_forward(x2, weight, bias))
    assert y2.shape == (8449, 1)
    assert jnp.allclose(y2, x2 @ weight.T + bias, atol=1e-6), "mismatch (unaligned f32)"

    # 3) Tiny batch (< _LANE) -> pure XLA path (kernel launch not worth it).
    x3 = jax.random.normal(k_x, (8, 1), dtype=jnp.float32)
    y3 = jax.block_until_ready(linear_regression_forward(x3, weight, bias))
    assert jnp.allclose(y3, x3 @ weight.T + bias, atol=1e-6), "mismatch (tiny f32)"

    # 4) bf16 input: bf16 streamed through the kernel, f32 compute, bf16 output.
    x4 = jax.random.normal(k_x, (16384, 1), dtype=jnp.bfloat16)
    y4 = jax.block_until_ready(linear_regression_forward(x4, weight, bias))
    y4_ref = (x4.astype(jnp.float32) @ weight.T + bias).astype(jnp.bfloat16)
    assert y4.dtype == jnp.bfloat16
    assert jnp.allclose(y4.astype(jnp.float32), y4_ref.astype(jnp.float32),
                        atol=2e-2), "mismatch (bf16)"

    print("KERNEL_OK")
</pallas_src>

<mosaic_0001>
module attributes {stable_mosaic.version = 11 : i64} {
  func.func @_affine_kernel(%arg0: i32, %arg1: memref<2xf32, #tpu.memory_space<smem>>, %arg2: memref<8x1024xf32, #tpu.memory_space<vmem>>, %arg3: memref<8x1024xf32, #tpu.memory_space<vmem>>) attributes {dimension_semantics = [#tpu.dimension_semantics<parallel>], iteration_bounds = array<i64: 1>, scalar_prefetch = 0 : i64, scratch_operands = 0 : i64, tpu.core_type = #tpu.core_type<tc>, window_params = [{transform_indices = @transform_0, window_bounds = array<i64: 2>}, {transform_indices = @transform_1, window_bounds = array<i64: 8, 1024>}, {transform_indices = @transform_2, window_bounds = array<i64: 8, 1024>}]} {
    %c0 = arith.constant 0 : index
    %c0_0 = arith.constant 0 : index
    %0 = vector.load %arg2[%c0, %c0_0] : memref<8x1024xf32, #tpu.memory_space<vmem>>, vector<8x1024xf32>
    %c0_1 = arith.constant 0 : index
    %1 = memref.load %arg1[%c0_1] : memref<2xf32, #tpu.memory_space<smem>>
    %2 = vector.broadcast %1 : f32 to vector<8x1024xf32>
    %3 = arith.mulf %0, %2 : vector<8x1024xf32>
    %c1 = arith.constant 1 : index
    %4 = memref.load %arg1[%c1] : memref<2xf32, #tpu.memory_space<smem>>
    %5 = vector.broadcast %4 : f32 to vector<8x1024xf32>
    %6 = arith.addf %3, %5 : vector<8x1024xf32>
    %c0_2 = arith.constant 0 : index
    %c0_3 = arith.constant 0 : index
    %7 = vector.load %arg3[%c0_2, %c0_3] : memref<8x1024xf32, #tpu.memory_space<vmem>>, vector<8x1024xf32>
    tpu.vector_store %arg3[%c0_2, %c0_3], %6 {strides = array<i32>} : memref<8x1024xf32, #tpu.memory_space<vmem>>, vector<8x1024xf32>,
    return
  }
  func.func @transform_0(%arg0: i32) -> i32 {
    %c0_i32 = arith.constant 0 : i32
    %c0_i32_0 = arith.constant 0 : i32
    return %c0_i32 : i32
  }
  func.func @transform_1(%arg0: i32) -> (i32, i32) {
    %c0_i32 = arith.constant 0 : i32
    %c0_i32_0 = arith.constant 0 : i32
    return %arg0, %c0_i32 : i32, i32
  }
  func.func @transform_2(%arg0: i32) -> (i32, i32) {
    %c0_i32 = arith.constant 0 : i32
    %c0_i32_0 = arith.constant 0 : i32
    return %arg0, %c0_i32 : i32, i32
  }
}

</mosaic_0001>

<bundles_post_ra>
// kernel: tpu_custom_call.1
= control target key start
LH: loop header
LB: loop body
LE: loop exit
PB: predicated region body
PF: predicated region fallthrough
CT: control target
= control target key end

     0   :  { %7 = vsyncpa [#allocation5], 0  ;;  %s205_s0 = inlined_call_operand.hbm [shape: f32[2], index: 0, kind: input, shape index: {}]   ;;  %s206_s1 = inlined_call_operand.hbm [shape: f32[8,1024], index: 1, kind: input, shape index: {}]   ;;  %s207_s2 = inlined_call_operand.hbm [shape: f32[8,1024], index: 2, kind: output, shape index: {}]  }
   0x1   :  { %8 = vsyncpa [#allocation3], 0 }
   0x2   :  { %9 = vsyncpa [#allocation4], 0  ;;  %s91_s11 = scalar_lea.hbm %s205_s0, 16 }
   0x3   :  { %p92_p0 = scmp.ne.s32.totalorder %s205_s0, %s91_s11  ;;  %p95_p1 = scmp.lt.u32.totalorder %s91_s11, %s205_s0 }
   0x5   :  { %p97_p2 = pnand %p95_p1, %p92_p0 }
   0x7   :  { %100 = shalt.err (!%p97_p2)
}
   0x8   :  { %s151_s16 = smov [#allocation2]   ;;  %s152_s19 = smov [#allocation6]  }
   0x9   :  { %17 = dma.hbm_to_smem %s205_s0, 16, %s151_s16, [#allocation5]  }
   0xa   :  { %s24_s20 = sshll.u32 %s152_s19, 4  ;;  %s101_s23 = scalar_lea.hbm %s206_s1, 1024  ;;  %s25_s20 = int_to_ptr.vmem [resolvable:$true] %s24_s20 }
   0xb   :  { %p102_p3 = scmp.ne.s32.totalorder %s206_s1, %s101_s23  ;;  %p105_p4 = scmp.lt.u32.totalorder %s101_s23, %s206_s1 }
   0xd   :  { %p107_p5 = pnand %p105_p4, %p102_p3 }
   0xf   :  { %110 = shalt.err (!%p107_p5)
}
  0x10   :  { %s111_s28 = scalar_lea.vmem %s25_s20, 1024  ;;  %p116_p7 = scmp.lt.s32.totalorder %s25_s20, %s25_s20 }
  0x11   :  { %p112_p6 = scmp.ne.s32.totalorder %s25_s20, %s111_s28  ;;  %p117_p8 = scmp.lt.s32.totalorder %s111_s28, %s111_s28 }
  0x13   :  { %p118_p9 = por %p117_p8, %p116_p7 }
  0x15   :  { %p119_p10 = pnand %p118_p9, %p112_p6 }
  0x17   :  { %122 = shalt.err (!%p119_p10)
}
  0x18   :  { %27 = dma.hbm_to_vmem [thread:$0]  %s206_s1, 1024, %s25_s20, [#allocation3]  }
  0x19   :  { %145 = dma.done.wait [#allocation5], 16  }
  0x1a   :  { %146 = vsyncadd [#allocation5], 4294967280 }
  0x1b   :  { %147 = dma.done.wait [#allocation3], 1024  }
  0x1c   :  { %148 = vsyncadd [#allocation3], 4294966272 }
  0x1d   :  { %34 = sfence }
  0x1e   :  { %s43_s30 = sld [smem:[#allocation2]]  ;;  %s87_s3 = sld [smem:[#allocation2 + $0x1]]  ;;  %v35_v0 = vld [vmem:[#allocation6] sm:$0xff]  ;;  %v36_v1 = vld [vmem:[#allocation6 + $0x8] sm:$0xff]  ;;  %v37_v2 = vld [vmem:[#allocation6 + $0x10] sm:$0xff] }
  0x1f   :  { %v38_v3 = vld [vmem:[#allocation6 + $0x18] sm:$0xff]  ;;  %v39_v4 = vld [vmem:[#allocation6 + $0x20] sm:$0xff]  ;;  %v40_v5 = vld [vmem:[#allocation6 + $0x28] sm:$0xff]  ;;  %s153_s1 = smov [#allocation7]  }
  0x20   :  { %v41_v6 = vld [vmem:[#allocation6 + $0x30] sm:$0xff]  ;;  %v42_v7 = vld [vmem:[#allocation6 + $0x38] sm:$0xff]  ;;  %s77_s4 = sshll.u32 %s153_s1, 4  ;;  %s78_s4 = int_to_ptr.vmem [resolvable:$true] %s77_s4 }
  0x21   :  { %s123_s5 = scalar_lea.vmem %s78_s4, 1024  ;;  %p128_p12 = scmp.lt.s32.totalorder %s78_s4, %s78_s4 }
  0x22   :  { %p124_p11 = scmp.ne.s32.totalorder %s78_s4, %s123_s5  ;;  %p129_p13 = scmp.lt.s32.totalorder %s123_s5, %s123_s5 }
  0x24   :  { %v44_v8 = vstv %s43_s30  ;;  %v54_v9 = vstv %s87_s3  ;;  %p130_p0 = por %p129_p13, %p128_p12 }
  0x25   :  { %v45_v10 = vmul.f32 %v44_v8, %v35_v0  ;;  %v46_v11 = vmul.f32 %v44_v8, %v36_v1  ;;  %v47_v12 = vmul.f32 %v44_v8, %v37_v2  ;;  %v48_v13 = vmul.f32 %v44_v8, %v38_v3 }
  0x26   :  { %v49_v14 = vmul.f32 %v44_v8, %v39_v4  ;;  %v50_v15 = vmul.f32 %v44_v8, %v40_v5  ;;  %v51_v16 = vmul.f32 %v44_v8, %v41_v6  ;;  %v52_v17 = vmul.f32 %v44_v8, %v42_v7  ;;  %p131_p1 = pnand %p130_p0, %p124_p11 }
  0x27   :  { %v55_v18 = vadd.f32 %v54_v9, %v45_v10  ;;  %v56_v19 = vadd.f32 %v54_v9, %v46_v11  ;;  %v57_v20 = vadd.f32 %v54_v9, %v47_v12  ;;  %v58_v21 = vadd.f32 %v54_v9, %v48_v13 }
  0x28   :  { %v59_v22 = vadd.f32 %v54_v9, %v49_v14  ;;  %v60_v23 = vadd.f32 %v54_v9, %v50_v15  ;;  %v61_v24 = vadd.f32 %v54_v9, %v51_v16  ;;  %v62_v25 = vadd.f32 %v54_v9, %v52_v17 }
  0x29   :  { %63 = vst [vmem:[#allocation7] sm:$0xff] %v55_v18  ;;  %64 = vst [vmem:[#allocation7 + $0x8] sm:$0xff] %v56_v19 }
  0x2a   :  { %65 = vst [vmem:[#allocation7 + $0x10] sm:$0xff] %v57_v20  ;;  %66 = vst [vmem:[#allocation7 + $0x18] sm:$0xff] %v58_v21 }
  0x2b   :  { %67 = vst [vmem:[#allocation7 + $0x20] sm:$0xff] %v59_v22  ;;  %68 = vst [vmem:[#allocation7 + $0x28] sm:$0xff] %v60_v23 }
  0x2c   :  { %69 = vst [vmem:[#allocation7 + $0x30] sm:$0xff] %v61_v24  ;;  %70 = vst [vmem:[#allocation7 + $0x38] sm:$0xff] %v62_v25 }
  0x2d   :  { %134 = shalt.err (!%p131_p1)
}
  0x2e   :  { %s135_s8 = scalar_lea.hbm %s207_s2, 1024 }
  0x2f   :  { %p136_p2 = scmp.ne.s32.totalorder %s207_s2, %s135_s8  ;;  %p139_p3 = scmp.lt.u32.totalorder %s135_s8, %s207_s2 }
  0x31   :  { %p141_p4 = pnand %p139_p3, %p136_p2 }
  0x33   :  { %144 = shalt.err (!%p141_p4)
}
  0x34   :  { %80 = dma.vmem_to_hbm [thread:$0]  %s78_s4, 1024, %s207_s2, [#allocation4]  }
  0x35   :  { %149 = dma.done.wait [#allocation4], 1024  }
  0x36   :  { %150 = vsyncadd [#allocation4], 4294966272 }
  0x37   :  { %84 = vsyncpa [#allocation3], 1 }
  0x38   :  { %85 = vsyncpa [#allocation4], 1 }
  0x39   :  { %86 = vsyncpa [#allocation5], 1 }

</bundles_post_ra>
